<compile_context>
chip_gen: v5e
topology: v5e:2x2
jax: 0.10.0
libtpu: 0.0.40
codegen_flags: <defaults>
</compile_context>

<pallas_src>
import functools

import jax
import jax.numpy as jnp
from jax.experimental import pallas as pl
from jax.experimental.pallas import tpu as pltpu


# -----------------------------------------------------------------------------
# Fused kernel: whole PointNetST stack on one row-tile of the (padded) batch.
#   refs = (x_ref, w_0, b_0, w_1, b_1, ..., w_{L-1}, b_{L-1}, o_ref)
# -----------------------------------------------------------------------------
def _pointnetst_fused_kernel(*refs, num_layers):
    x_ref = refs[0]
    o_ref = refs[-1]
    h = x_ref[...]  # (TB, P) f32, padded lane-dense activation
    for i in range(num_layers):
        w_ref = refs[1 + 2 * i]   # (P, P)
        b_ref = refs[2 + 2 * i]   # (1, P)
        # Conv1d(kernel=1) over a length-1 sequence == row-wise matmul (MXU, f32 acc).
        h = jnp.dot(h, w_ref[...], preferred_element_type=jnp.float32) + b_ref[...]
        # NOTE: for the DeepSet layer, layer2 acts on (x - x.mean(dim=2)) which is
        # identically 0 because the module reshapes the input to set length 1, so the
        # layer2 matmul is algebraically omitted here (reference below keeps it).
        if i < num_layers - 1:
            h = jnp.maximum(h, 0.0)
    o_ref[...] = h.astype(o_ref.dtype)


def _round_up(v, m):
    return ((v + m - 1) // m) * m


def _pad2d(a, rows, cols):
    r, c = a.shape
    return jnp.pad(a, ((0, rows - r), (0, cols - c)))


# -----------------------------------------------------------------------------
# Wrapper: pad to MXU/lane-friendly shapes, single pallas_call over row tiles.
# -----------------------------------------------------------------------------
def pointnetst_forward(params, x, dims, *, tile_rows=256):
    b = x.shape[0]
    xf = x.reshape(b, -1).astype(jnp.float32)          # x.view((B,1,-1)).transpose(2,1)
    assert xf.shape[1] == dims[0], "flattened input must have dims[0] features"

    num_layers = len(dims) - 1
    deepset_idx = len(dims) // 2

    p = _round_up(max(dims), 128)                      # lane-dense common feature width
    tb = min(_round_up(b, 8), tile_rows)               # row tile (multiple of 8 sublanes)
    b_pad = _round_up(b, tb)

    flat_inputs = [_pad2d(xf, b_pad, p)]
    in_specs = [pl.BlockSpec((tb, p), lambda i: (i, 0))]

    for i in range(num_layers):
        if i == deepset_idx:
            w, bias = params[i][0], params[i][1]       # DeepSetLayer.layer1
            # params[i][2] (layer2 weight, no bias) multiplies (x - mean over the set dim),
            # which is exactly zero given the module's view/transpose (set length 1).
        else:
            w, bias = params[i]
        flat_inputs.append(_pad2d(w, p, p))
        flat_inputs.append(_pad2d(bias.reshape(1, -1), 1, p))
        in_specs.append(pl.BlockSpec((p, p), lambda i: (0, 0)))   # weights resident
        in_specs.append(pl.BlockSpec((1, p), lambda i: (0, 0)))   # bias resident

    kernel = functools.partial(_pointnetst_fused_kernel, num_layers=num_layers)
    out_pad = pl.pallas_call(
        kernel,
        out_shape=jax.ShapeDtypeStruct((b_pad, p), jnp.float32),
        grid=(b_pad // tb,),
        in_specs=in_specs,
        out_specs=pl.BlockSpec((tb, p), lambda i: (i, 0)),
        compiler_params=pltpu.CompilerParams(
            dimension_semantics=("parallel",)),
    )(*flat_inputs)

    # final x.transpose(2,1).view((B,-1)) -> (B, dims[-1]); drop padding.
    return out_pad[:b, :dims[-1]]


# -----------------------------------------------------------------------------
# Parameter init (mirrors PyTorch Conv1d defaults, weights stored as (in, out))
# -----------------------------------------------------------------------------
def init_pointnetst_params(dims, key):
    num_layers = len(dims) - 1
    deepset_idx = len(dims) // 2
    params = []
    for i in range(num_layers):
        fan_in, fan_out = dims[i], dims[i + 1]
        bound = 1.0 / float(fan_in) ** 0.5
        if i == deepset_idx:
            key, k1, k2, k3 = jax.random.split(key, 4)
            w1 = jax.random.uniform(k1, (fan_in, fan_out), jnp.float32, -bound, bound)
            b1 = jax.random.uniform(k2, (fan_out,), jnp.float32, -bound, bound)
            w2 = jax.random.uniform(k3, (fan_in, fan_out), jnp.float32, -bound, bound)
            params.append((w1, b1, w2))
        else:
            key, k1, k2 = jax.random.split(key, 3)
            w = jax.random.uniform(k1, (fan_in, fan_out), jnp.float32, -bound, bound)
            bb = jax.random.uniform(k2, (fan_out,), jnp.float32, -bound, bound)
            params.append((w, bb))
    return params


# -----------------------------------------------------------------------------
# Pure-JAX faithful port of PointNetST.forward (keeps the DeepSet layer2 term).
# -----------------------------------------------------------------------------
def _reference_forward(params, x, dims):
    b = x.shape[0]
    h = x.reshape(b, 1, -1)            # view((B, 1, -1))
    h = jnp.swapaxes(h, 1, 2)          # transpose(2, 1) -> (B, C=dims[0], T=1)
    num_layers = len(dims) - 1
    deepset_idx = len(dims) // 2
    for i in range(num_layers):
        if i == deepset_idx:
            w1, b1, w2 = params[i]
            out = jnp.einsum("bct,co->bot", h, w1) + b1[None, :, None]
            centered = h - h.mean(axis=2, keepdims=True)
            out = out + jnp.einsum("bct,co->bot", centered, w2)
        else:
            w, bias = params[i]
            out = jnp.einsum("bct,co->bot", h, w) + bias[None, :, None]
        if i < num_layers - 1:
            out = jnp.maximum(out, 0.0)
        h = out
    h = jnp.swapaxes(h, 1, 2)          # (B, 1, dims[-1])
    return h.reshape(b, -1)            # (B, dims[-1])


# -----------------------------------------------------------------------------
if __name__ == "__main__":
    key = jax.random.PRNGKey(0)

    # Small shapes consistent with the module: batch=16, dims=[32, 64, 64, 64, 16]
    # (DeepSet layer sits at index len(dims)//2 == 2, i.e. mid-stack with ReLU).
    B = 16
    dims = [32, 64, 64, 64, 16]

    key, kx, kp = jax.random.split(key, 3)
    x = jax.random.normal(kx, (B, dims[0]), jnp.float32)
    params = init_pointnetst_params(dims, kp)

    out = pointnetst_forward(params, x, dims)
    out = jax.block_until_ready(out)

    ref = _reference_forward(params, x, dims)
    assert out.shape == (B, dims[-1])
    max_err = float(jnp.max(jnp.abs(out - ref)))
    assert jnp.allclose(out, ref, atol=1e-3, rtol=1e-3), f"mismatch vs reference, max|err|={max_err}"

    print("KERNEL_OK")
</pallas_src>

<mosaic_0001>
module attributes {stable_mosaic.version = 11 : i64} {
  func.func @_pointnetst_fused_kernel(%arg0: i32, %arg1: memref<16x128xf32, #tpu.memory_space<vmem>>, %arg2: memref<128x128xf32, #tpu.memory_space<vmem>>, %arg3: memref<1x128xf32, #tpu.memory_space<vmem>>, %arg4: memref<128x128xf32, #tpu.memory_space<vmem>>, %arg5: memref<1x128xf32, #tpu.memory_space<vmem>>, %arg6: memref<128x128xf32, #tpu.memory_space<vmem>>, %arg7: memref<1x128xf32, #tpu.memory_space<vmem>>, %arg8: memref<128x128xf32, #tpu.memory_space<vmem>>, %arg9: memref<1x128xf32, #tpu.memory_space<vmem>>, %arg10: memref<16x128xf32, #tpu.memory_space<vmem>>) attributes {dimension_semantics = [#tpu.dimension_semantics<parallel>], iteration_bounds = array<i64: 1>, scalar_prefetch = 0 : i64, scratch_operands = 0 : i64, tpu.core_type = #tpu.core_type<tc>, window_params = [{transform_indices = @transform_0, window_bounds = array<i64: 16, 128>}, {pipeline_mode = #tpu.pipeline_mode<synchronous>, transform_indices = @transform_1, window_bounds = array<i64: 128, 128>}, {pipeline_mode = #tpu.pipeline_mode<synchronous>, transform_indices = @transform_2, window_bounds = array<i64: 1, 128>}, {pipeline_mode = #tpu.pipeline_mode<synchronous>, transform_indices = @transform_3, window_bounds = array<i64: 128, 128>}, {pipeline_mode = #tpu.pipeline_mode<synchronous>, transform_indices = @transform_4, window_bounds = array<i64: 1, 128>}, {pipeline_mode = #tpu.pipeline_mode<synchronous>, transform_indices = @transform_5, window_bounds = array<i64: 128, 128>}, {pipeline_mode = #tpu.pipeline_mode<synchronous>, transform_indices = @transform_6, window_bounds = array<i64: 1, 128>}, {pipeline_mode = #tpu.pipeline_mode<synchronous>, transform_indices = @transform_7, window_bounds = array<i64: 128, 128>}, {pipeline_mode = #tpu.pipeline_mode<synchronous>, transform_indices = @transform_8, window_bounds = array<i64: 1, 128>}, {transform_indices = @transform_9, window_bounds = array<i64: 16, 128>}]} {
    %c0 = arith.constant 0 : index
    %c0_0 = arith.constant 0 : index
    %0 = vector.load %arg1[%c0, %c0_0] : memref<16x128xf32, #tpu.memory_space<vmem>>, vector<16x128xf32>
    %c0_1 = arith.constant 0 : index
    %c0_2 = arith.constant 0 : index
    %1 = vector.load %arg2[%c0_1, %c0_2] : memref<128x128xf32, #tpu.memory_space<vmem>>, vector<128x128xf32>
    %cst = arith.constant dense<0.000000e+00> : vector<16x128xf32>
    %2 = tpu.matmul %0, %1, %cst {dimension_numbers = #tpu.dot_dimension_numbers<[1], [0], [0], [1], [0, 0, 1, 1], [], []>} : vector<16x128xf32>, vector<128x128xf32>, vector<16x128xf32> -> vector<16x128xf32>
    %c0_3 = arith.constant 0 : index
    %c0_4 = arith.constant 0 : index
    %3 = vector.load %arg3[%c0_3, %c0_4] : memref<1x128xf32, #tpu.memory_space<vmem>>, vector<1x128xf32>
    %4 = vector.broadcast %3 : vector<1x128xf32> to vector<16x128xf32>
    %5 = arith.addf %2, %4 : vector<16x128xf32>
    %cst_5 = arith.constant 0.000000e+00 : f32
    %6 = vector.broadcast %cst_5 : f32 to vector<16x128xf32>
    %7 = arith.maximumf %5, %6 : vector<16x128xf32>
    %c0_6 = arith.constant 0 : index
    %c0_7 = arith.constant 0 : index
    %8 = vector.load %arg4[%c0_6, %c0_7] : memref<128x128xf32, #tpu.memory_space<vmem>>, vector<128x128xf32>
    %cst_8 = arith.constant dense<0.000000e+00> : vector<16x128xf32>
    %9 = tpu.matmul %7, %8, %cst_8 {dimension_numbers = #tpu.dot_dimension_numbers<[1], [0], [0], [1], [0, 0, 1, 1], [], []>} : vector<16x128xf32>, vector<128x128xf32>, vector<16x128xf32> -> vector<16x128xf32>
    %c0_9 = arith.constant 0 : index
    %c0_10 = arith.constant 0 : index
    %10 = vector.load %arg5[%c0_9, %c0_10] : memref<1x128xf32, #tpu.memory_space<vmem>>, vector<1x128xf32>
    %11 = vector.broadcast %10 : vector<1x128xf32> to vector<16x128xf32>
    %12 = arith.addf %9, %11 : vector<16x128xf32>
    %cst_11 = arith.constant 0.000000e+00 : f32
    %13 = vector.broadcast %cst_11 : f32 to vector<16x128xf32>
    %14 = arith.maximumf %12, %13 : vector<16x128xf32>
    %c0_12 = arith.constant 0 : index
    %c0_13 = arith.constant 0 : index
    %15 = vector.load %arg6[%c0_12, %c0_13] : memref<128x128xf32, #tpu.memory_space<vmem>>, vector<128x128xf32>
    %cst_14 = arith.constant dense<0.000000e+00> : vector<16x128xf32>
    %16 = tpu.matmul %14, %15, %cst_14 {dimension_numbers = #tpu.dot_dimension_numbers<[1], [0], [0], [1], [0, 0, 1, 1], [], []>} : vector<16x128xf32>, vector<128x128xf32>, vector<16x128xf32> -> vector<16x128xf32>
    %c0_15 = arith.constant 0 : index
    %c0_16 = arith.constant 0 : index
    %17 = vector.load %arg7[%c0_15, %c0_16] : memref<1x128xf32, #tpu.memory_space<vmem>>, vector<1x128xf32>
    %18 = vector.broadcast %17 : vector<1x128xf32> to vector<16x128xf32>
    %19 = arith.addf %16, %18 : vector<16x128xf32>
    %cst_17 = arith.constant 0.000000e+00 : f32
    %20 = vector.broadcast %cst_17 : f32 to vector<16x128xf32>
    %21 = arith.maximumf %19, %20 : vector<16x128xf32>
    %c0_18 = arith.constant 0 : index
    %c0_19 = arith.constant 0 : index
    %22 = vector.load %arg8[%c0_18, %c0_19] : memref<128x128xf32, #tpu.memory_space<vmem>>, vector<128x128xf32>
    %cst_20 = arith.constant dense<0.000000e+00> : vector<16x128xf32>
    %23 = tpu.matmul %21, %22, %cst_20 {dimension_numbers = #tpu.dot_dimension_numbers<[1], [0], [0], [1], [0, 0, 1, 1], [], []>} : vector<16x128xf32>, vector<128x128xf32>, vector<16x128xf32> -> vector<16x128xf32>
    %c0_21 = arith.constant 0 : index
    %c0_22 = arith.constant 0 : index
    %24 = vector.load %arg9[%c0_21, %c0_22] : memref<1x128xf32, #tpu.memory_space<vmem>>, vector<1x128xf32>
    %25 = vector.broadcast %24 : vector<1x128xf32> to vector<16x128xf32>
    %26 = arith.addf %23, %25 : vector<16x128xf32>
    %c0_23 = arith.constant 0 : index
    %c0_24 = arith.constant 0 : index
    %27 = vector.load %arg10[%c0_23, %c0_24] : memref<16x128xf32, #tpu.memory_space<vmem>>, vector<16x128xf32>
    tpu.vector_store %arg10[%c0_23, %c0_24], %26 {strides = array<i32>} : memref<16x128xf32, #tpu.memory_space<vmem>>, vector<16x128xf32>,
    return
  }
  func.func @transform_0(%arg0: i32) -> (i32, i32) {
    %c0_i32 = arith.constant 0 : i32
    %c0_i32_0 = arith.constant 0 : i32
    return %arg0, %c0_i32 : i32, i32
  }
  func.func @transform_1(%arg0: i32) -> (i32, i32) {
    %c0_i32 = arith.constant 0 : i32
    %c0_i32_0 = arith.constant 0 : i32
    %c0_i32_1 = arith.constant 0 : i32
    return %c0_i32, %c0_i32_0 : i32, i32
  }
  func.func @transform_2(%arg0: i32) -> (i32, i32) {
    %c0_i32 = arith.constant 0 : i32
    %c0_i32_0 = arith.constant 0 : i32
    %c0_i32_1 = arith.constant 0 : i32
    return %c0_i32, %c0_i32_0 : i32, i32
  }
  func.func @transform_3(%arg0: i32) -> (i32, i32) {
    %c0_i32 = arith.constant 0 : i32
    %c0_i32_0 = arith.constant 0 : i32
    %c0_i32_1 = arith.constant 0 : i32
    return %c0_i32, %c0_i32_0 : i32, i32
  }
  func.func @transform_4(%arg0: i32) -> (i32, i32) {
    %c0_i32 = arith.constant 0 : i32
    %c0_i32_0 = arith.constant 0 : i32
    %c0_i32_1 = arith.constant 0 : i32
    return %c0_i32, %c0_i32_0 : i32, i32
  }
  func.func @transform_5(%arg0: i32) -> (i32, i32) {
    %c0_i32 = arith.constant 0 : i32
    %c0_i32_0 = arith.constant 0 : i32
    %c0_i32_1 = arith.constant 0 : i32
    return %c0_i32, %c0_i32_0 : i32, i32
  }
  func.func @transform_6(%arg0: i32) -> (i32, i32) {
    %c0_i32 = arith.constant 0 : i32
    %c0_i32_0 = arith.constant 0 : i32
    %c0_i32_1 = arith.constant 0 : i32
    return %c0_i32, %c0_i32_0 : i32, i32
  }
  func.func @transform_7(%arg0: i32) -> (i32, i32) {
    %c0_i32 = arith.constant 0 : i32
    %c0_i32_0 = arith.constant 0 : i32
    %c0_i32_1 = arith.constant 0 : i32
    return %c0_i32, %c0_i32_0 : i32, i32
  }
  func.func @transform_8(%arg0: i32) -> (i32, i32) {
    %c0_i32 = arith.constant 0 : i32
    %c0_i32_0 = arith.constant 0 : i32
    %c0_i32_1 = arith.constant 0 : i32
    return %c0_i32, %c0_i32_0 : i32, i32
  }
  func.func @transform_9(%arg0: i32) -> (i32, i32) {
    %c0_i32 = arith.constant 0 : i32
    %c0_i32_0 = arith.constant 0 : i32
    return %arg0, %c0_i32 : i32, i32
  }
}

</mosaic_0001>

<bundles_post_ra>
// kernel: tpu_custom_call.1
= control target key start
LH: loop header
LB: loop body
LE: loop exit
PB: predicated region body
PF: predicated region fallthrough
CT: control target
= control target key end

     0   :  { %14 = vsyncpa [#allocation3], 0  ;;  %s584_s0 = inlined_call_operand.hbm [shape: f32[16,128], index: 0, kind: input, shape index: {}]   ;;  %s585_s1 = inlined_call_operand.hbm [shape: f32[128,128], index: 1, kind: input, shape index: {}]   ;;  %s586_s2 = inlined_call_operand.vmem [shape: f32[1,128], index: 2, kind: input, shape index: {}]   ;;  %s587_s3 = inlined_call_operand.hbm [shape: f32[128,128], index: 3, kind: input, shape index: {}]   ;;  %s588_s4 = inlined_call_operand.vmem [shape: f32[1,128], index: 4, kind: input, shape index: {}]   ;;  %s589_s5 = inlined_call_operand.hbm [shape: f32[128,128], index: 5, kind: input, shape index: {}]   ;;  %s590_s6 = inlined_call_operand.vmem [shape: f32[1,128], index: 6, kind: input, shape index: {}]   ;;  %s591_s7 = inlined_call_operand.hbm [shape: f32[128,128], index: 7, kind: input, shape index: {}]   ;;  %s592_s8 = inlined_call_operand.vmem [shape: f32[1,128], index: 8, kind: input, shape index: {}]   ;;  %s593_s9 = inlined_call_operand.hbm [shape: f32[16,128], index: 9, kind: output, shape index: {}]  }
   0x1   :  { %15 = vsyncpa [#allocation6], 0 }
   0x2   :  { %16 = vsyncpa [#allocation9], 0 }
   0x3   :  { %17 = vsyncpa [#allocation4], 0  ;;  %s35_s11 = sshll.u32 %s585_s1, 4  ;;  %s478_s12 = smov [#allocation5]   ;;  %s36_s11 = int_to_ptr.hbm [resolvable:$true] %s35_s11 }
   0x4   :  { %s37_s13 = sshll.u32 %s478_s12, 4  ;;  %s65_s16 = sshll.u32 %s589_s5, 4  ;;  %s38_s13 = int_to_ptr.vmem [resolvable:$true] %s37_s13  ;;  %s66_s16 = int_to_ptr.hbm [resolvable:$true] %s65_s16 }
   0x5   :  { %s479_s17 = smov 128   ;;  %s480_s18 = smov 8  }
   0x6   :  { %43 = dma.hbm_to_vmem [thread:$0]  %s36_s11, 2048, %s38_s13, [#allocation6], %s479_s17, %s479_s17, %s480_s18  }
   0x7   :  { %s481_s19 = smov [#allocation8]   ;;  %s22_s1 = sshll.u32 %s584_s0, 4  ;;  %s23_s1 = int_to_ptr.hbm [resolvable:$true] %s22_s1 }
   0x8   :  { %s67_s20 = sshll.u32 %s481_s19, 4  ;;  %s50_s24 = sshll.u32 %s587_s3, 4  ;;  %s68_s20 = int_to_ptr.vmem [resolvable:$true] %s67_s20  ;;  %s51_s24 = int_to_ptr.hbm [resolvable:$true] %s50_s24 }
   0x9   :  { %73 = dma.hbm_to_vmem [thread:$0]  %s66_s16, 2048, %s68_s20, [#allocation9], %s479_s17, %s479_s17, %s480_s18  }
   0xa   :  { %s482_s25 = smov [#allocation2]   ;;  %s483_s27 = smov [#allocation7]  }
   0xb   :  { %s24_s26 = sshll.u32 %s482_s25, 4  ;;  %s52_s0 = sshll.u32 %s483_s27, 4  ;;  %s25_s26 = int_to_ptr.vmem [resolvable:$true] %s24_s26  ;;  %s53_s0 = int_to_ptr.vmem [resolvable:$true] %s52_s0 }
   0xc   :  { %30 = dma.hbm_to_vmem [thread:$0]  %s23_s1, 256, %s25_s26, [#allocation3], %s479_s17, %s479_s17, %s480_s18  }
   0xd   :  { %s80_s30 = sshll.u32 %s591_s7, 4  ;;  %s484_s3 = smov [#allocation10]   ;;  %s81_s30 = int_to_ptr.hbm [resolvable:$true] %s80_s30 }
   0xe   :  { %58 = dma.hbm_to_vmem [thread:$0]  %s51_s24, 2048, %s53_s0, [#allocation6], %s479_s17, %s479_s17, %s480_s18  }
   0xf   :  { %s82_s10 = sshll.u32 %s484_s3, 4  ;;  %s83_s10 = int_to_ptr.vmem [resolvable:$true] %s82_s10 }
  0x10   :  { %88 = dma.hbm_to_vmem [thread:$0]  %s81_s30, 2048, %s83_s10, [#allocation9], %s479_s17, %s479_s17, %s480_s18  }
  0x11   :  { %470 = dma.done.wait [#allocation3], 256  }
  0x12   :  { %471 = vsyncadd [#allocation3], 4294967040 }
  0x13   :  { %472 = dma.done.wait [#allocation6], 4096  }
  0x14   :  { %473 = vsyncadd [#allocation6], 4294963200 }
  0x15   :  { %474 = dma.done.wait [#allocation9], 4096  }
  0x16   :  { %475 = vsyncadd [#allocation9], 4294963200  ;;  %v128_v0 = vld [vmem:[#allocation5 + $0x78] sm:$0xff]  ;;  %v127_v1 = vld [vmem:[#allocation5 + $0x70] sm:$0xff]  ;;  %s485_s16 = smov [#allocation11]  }
  0x17   :  { %133 = vmatpush.msra.mxu0 %v128_v0  ;;  %v126_v2 = vld [vmem:[#allocation5 + $0x68] sm:$0xff]  ;;  %v125_v3 = vld [vmem:[#allocation5 + $0x60] sm:$0xff]  ;;  %v124_v4 = vld [vmem:[#allocation5 + $0x58] sm:$0xff]  ;;  %s297_s19 = sshll.u32 %s485_s16, 4  ;;  %s298_s19 = int_to_ptr.vmem [resolvable:$true] %s297_s19 }
  0x18   :  { %v123_v5 = vld [vmem:[#allocation5 + $0x50] sm:$0xff]  ;;  %v173_v6 = vld [vmem:[#allocation7 + $0x78] sm:$0xff]  ;;  %v122_v8 = vld [vmem:[#allocation5 + $0x48] sm:$0xff] }
  0x19   :  { %134 = vmatpush.msra.mxu0 %v127_v1  ;;  %v172_v7 = vld [vmem:[#allocation7 + $0x70] sm:$0xff]  ;;  %178 = vmatpush.msra.mxu1 %v173_v6  ;;  %v171_v9 = vld [vmem:[#allocation7 + $0x68] sm:$0xff]  ;;  %v121_v10 = vld [vmem:[#allocation5 + $0x40] sm:$0xff] }
  0x1a   :  { %v170_v11 = vld [vmem:[#allocation7 + $0x60] sm:$0xff]  ;;  %v120_v12 = vld [vmem:[#allocation5 + $0x38] sm:$0xff]  ;;  %v119_v14 = vld [vmem:[#allocation5 + $0x30] sm:$0xff] }
  0x1b   :  { %135 = vmatpush.msra.mxu0 %v126_v2  ;;  %179 = vmatpush.msra.mxu1 %v172_v7  ;;  %v169_v13 = vld [vmem:[#allocation7 + $0x58] sm:$0xff]  ;;  %v168_v15 = vld [vmem:[#allocation7 + $0x50] sm:$0xff]  ;;  %v118_v16 = vld [vmem:[#allocation5 + $0x28] sm:$0xff] }
  0x1c   :  { %v167_v17 = vld [vmem:[#allocation7 + $0x48] sm:$0xff]  ;;  %v117_v18 = vld [vmem:[#allocation5 + $0x20] sm:$0xff]  ;;  %v116_v20 = vld [vmem:[#allocation5 + $0x18] sm:$0xff] }
  0x1d   :  { %136 = vmatpush.msra.mxu0 %v125_v3  ;;  %180 = vmatpush.msra.mxu1 %v171_v9  ;;  %v166_v19 = vld [vmem:[#allocation7 + $0x40] sm:$0xff]  ;;  %v165_v21 = vld [vmem:[#allocation7 + $0x38] sm:$0xff]  ;;  %v115_v22 = vld [vmem:[#allocation5 + $0x10] sm:$0xff] }
  0x1e   :  { %v164_v23 = vld [vmem:[#allocation7 + $0x30] sm:$0xff]  ;;  %v114_v24 = vld [vmem:[#allocation5 + $0x8] sm:$0xff]  ;;  %v113_v26 = vld [vmem:[#allocation5] sm:$0xff] }
  0x1f   :  { %137 = vmatpush.msra.mxu0 %v124_v4  ;;  %181 = vmatpush.msra.mxu1 %v170_v11  ;;  %v163_v25 = vld [vmem:[#allocation7 + $0x28] sm:$0xff]  ;;  %v162_v27 = vld [vmem:[#allocation7 + $0x20] sm:$0xff]  ;;  %v111_v28 = vld [vmem:[#allocation2] sm:$0xff] }
  0x20   :  { %v161_v29 = vld [vmem:[#allocation7 + $0x18] sm:$0xff]  ;;  %v160_v31 = vld [vmem:[#allocation7 + $0x10] sm:$0xff]  ;;  %v159_v32 = vld [vmem:[#allocation7 + $0x8] sm:$0xff] }
  0x21   :  { %138 = vmatpush.msra.mxu0 %v123_v5  ;;  %182 = vmatpush.msra.mxu1 %v169_v13  ;;  %v112_v30 = vld [vmem:[#allocation2 + $0x8] sm:$0xff]  ;;  %v158_v33 = vld [vmem:[#allocation7] sm:$0xff]  ;;  %v217_v35 = vld [vmem:[#allocation8 + $0x70] sm:$0xff] }
  0x22   :  { %v218_v34 = vld [vmem:[#allocation8 + $0x78] sm:$0xff]  ;;  %v216_v36 = vld [vmem:[#allocation8 + $0x68] sm:$0xff]  ;;  %v215_v37 = vld [vmem:[#allocation8 + $0x60] sm:$0xff] }
  0x23   :  { %139 = vmatpush.msra.mxu0 %v122_v8  ;;  %183 = vmatpush.msra.mxu1 %v168_v15  ;;  %v214_v38 = vld [vmem:[#allocation8 + $0x58] sm:$0xff]  ;;  %v213_v39 = vld [vmem:[#allocation8 + $0x50] sm:$0xff]  ;;  %v212_v40 = vld [vmem:[#allocation8 + $0x48] sm:$0xff] }
  0x24   :  { %223 = vmatpush.msra.mxu2 %v218_v34  ;;  %v211_v41 = vld [vmem:[#allocation8 + $0x40] sm:$0xff]  ;;  %v210_v42 = vld [vmem:[#allocation8 + $0x38] sm:$0xff]  ;;  %v322_v43 = vld [vmem:[%s586_s2] ss:$0 sm:$0xff] }
  0x25   :  { %140 = vmatpush.msra.mxu0 %v121_v10  ;;  %184 = vmatpush.msra.mxu1 %v167_v17  ;;  %v209_v44 = vld [vmem:[#allocation8 + $0x30] sm:$0xff]  ;;  %v208_v45 = vld [vmem:[#allocation8 + $0x28] sm:$0xff]  ;;  %v207_v48 = vld [vmem:[#allocation8 + $0x20] sm:$0xff] }
  0x26   :  { %224 = vmatpush.msra.mxu2 %v217_v35  ;;  %v206_v50 = vld [vmem:[#allocation8 + $0x18] sm:$0xff]  ;;  %v205_v54 = vld [vmem:[#allocation8 + $0x10] sm:$0xff]  ;;  %v204_v55 = vld [vmem:[#allocation8 + $0x8] sm:$0xff] }
  0x27   :  { %141 = vmatpush.msra.mxu0 %v120_v12  ;;  %185 = vmatpush.msra.mxu1 %v166_v19  ;;  %v203_v56 = vld [vmem:[#allocation8] sm:$0xff]  ;;  %v263_v57 = vld [vmem:[#allocation10 + $0x78] sm:$0xff]  ;;  %v262_v58 = vld [vmem:[#allocation10 + $0x70] sm:$0xff] }
  0x28   :  { %225 = vmatpush.msra.mxu2 %v216_v36  ;;  %268 = vmatpush.msra.mxu3 %v263_v57  ;;  %v261_v59 = vld [vmem:[#allocation10 + $0x68] sm:$0xff]  ;;  %v260_v60 = vld [vmem:[#allocation10 + $0x60] sm:$0xff]  ;;  %v259_v61 = vld [vmem:[#allocation10 + $0x58] sm:$0xff] }
  0x29   :  { %142 = vmatpush.msra.mxu0 %v119_v14  ;;  %186 = vmatpush.msra.mxu1 %v165_v21  ;;  %v258_v62 = vld [vmem:[#allocation10 + $0x50] sm:$0xff]  ;;  %v257_v63 = vld [vmem:[#allocation10 + $0x48] sm:$0xff]  ;;  %v256_v0 = vld [vmem:[#allocation10 + $0x40] sm:$0xff] }
  0x2a   :  { %226 = vmatpush.msra.mxu2 %v215_v37  ;;  %269 = vmatpush.msra.mxu3 %v262_v58  ;;  %v255_v1 = vld [vmem:[#allocation10 + $0x38] sm:$0xff]  ;;  %v323_v2 = vld [vmem:[%s588_s4] ss:$0 sm:$0xff]  ;;  %v253_v4 = vld [vmem:[#allocation10 + $0x28] sm:$0xff] }
  0x2b   :  { %143 = vmatpush.msra.mxu0 %v118_v16  ;;  %187 = vmatpush.msra.mxu1 %v164_v23  ;;  %v254_v3 = vld [vmem:[#allocation10 + $0x30] sm:$0xff]  ;;  %v252_v7 = vld [vmem:[#allocation10 + $0x20] sm:$0xff]  ;;  %v251_v9 = vld [vmem:[#allocation10 + $0x18] sm:$0xff] }
  0x2c   :  { %227 = vmatpush.msra.mxu2 %v214_v38  ;;  %270 = vmatpush.msra.mxu3 %v261_v59  ;;  %v250_v13 = vld [vmem:[#allocation10 + $0x10] sm:$0xff]  ;;  %v249_v14 = vld [vmem:[#allocation10 + $0x8] sm:$0xff]  ;;  %v248_v15 = vld [vmem:[#allocation10] sm:$0xff] }
  0x2d   :  { %144 = vmatpush.msra.mxu0 %v117_v18  ;;  %188 = vmatpush.msra.mxu1 %v163_v25  ;;  %v324_v16 = vld [vmem:[%s590_s6] ss:$0 sm:$0xff]  ;;  %s299_s6 = sshll.u32 %s593_s9, 4  ;;  %s300_s6 = int_to_ptr.hbm [resolvable:$true] %s299_s6 }
  0x2e   :  { %228 = vmatpush.msra.mxu2 %v213_v39  ;;  %271 = vmatpush.msra.mxu3 %v260_v60  ;;  %v325_v23 = vld [vmem:[%s592_s8] ss:$0 sm:$0xff] }
  0x2f   :  { %145 = vmatpush.msra.mxu0 %v116_v20  ;;  %189 = vmatpush.msra.mxu1 %v162_v27 }
  0x30   :  { %229 = vmatpush.msra.mxu2 %v212_v40  ;;  %272 = vmatpush.msra.mxu3 %v259_v61 }
  0x31   :  { %146 = vmatpush.msra.mxu0 %v115_v22  ;;  %190 = vmatpush.msra.mxu1 %v161_v29 }
  0x32   :  { %230 = vmatpush.msra.mxu2 %v211_v41  ;;  %273 = vmatpush.msra.mxu3 %v258_v62 }
  0x33   :  { %147 = vmatpush.msra.mxu0 %v114_v24  ;;  %191 = vmatpush.msra.mxu1 %v160_v31 }
  0x34   :  { %231 = vmatpush.msra.mxu2 %v210_v42  ;;  %274 = vmatpush.msra.mxu3 %v257_v63 }
  0x35   :  { %148 = vmatpush.msra.mxu0 %v113_v26  ;;  %192 = vmatpush.msra.mxu1 %v159_v32 }
  0x36   :  { %149 = vmatmul.f32.vlgmr.msra.gmra.mxu0 %v111_v28  ;;  %232 = vmatpush.msra.mxu2 %v209_v44 }
  0x37   :  { %193 = vmatpush.msra.mxu1 %v158_v33  ;;  %275 = vmatpush.msra.mxu3 %v256_v0 }
  0x38   :  { %233 = vmatpush.msra.mxu2 %v208_v45 }
  0x39   :  { %276 = vmatpush.msra.mxu3 %v255_v1 }
  0x3a   :  { %234 = vmatpush.msra.mxu2 %v207_v48 }
  0x3b   :  { %277 = vmatpush.msra.mxu3 %v254_v3 }
  0x3c   :  { %235 = vmatpush.msra.mxu2 %v206_v50 }
  0x3d   :  { %278 = vmatpush.msra.mxu3 %v253_v4 }
  0x3e   :  { %152 = vmatmul.f32.gmra.mxu0 %v112_v30  ;;  %236 = vmatpush.msra.mxu2 %v205_v54 }
  0x3f   :  { %279 = vmatpush.msra.mxu3 %v252_v7 }
  0x40   :  { %237 = vmatpush.msra.mxu2 %v204_v55 }
  0x41   :  { %280 = vmatpush.msra.mxu3 %v251_v9 }
  0x42   :  { %238 = vmatpush.msra.mxu2 %v203_v56 }
  0x43   :  { %281 = vmatpush.msra.mxu3 %v250_v13 }
  0x45   :  { %282 = vmatpush.msra.mxu3 %v249_v14 }
  0x47   :  { %283 = vmatpush.msra.mxu3 %v248_v15 }
  0xb3   :  { %v150_v46 = vpop.f32.mrf.mxu0 }
  0xb4   :  { %v151_v47 = vadd.f32 %v322_v43, %v150_v46 }
  0xb6   :  { %v156_v49 = vmax.f32 %v151_v47, 0.0 }
  0xb8   :  { %194 = vmatmul.f32.vlgmr.msra.gmra.mxu1 %v156_v49 }
  0xbb   :  { %v153_v51 = vpop.f32.mrf.mxu0 }
  0xbc   :  { %v154_v52 = vadd.f32 %v322_v43, %v153_v51 }
  0xbe   :  { %v157_v53 = vmax.f32 %v154_v52, 0.0 }
  0xc0   :  { %197 = vmatmul.f32.gmra.mxu1 %v157_v53 }
 0x135   :  { %v195_v5 = vpop.f32.mrf.mxu1 }
 0x136   :  { %v196_v6 = vadd.f32 %v323_v2, %v195_v5 }
 0x138   :  { %v201_v8 = vmax.f32 %v196_v6, 0.0 }
 0x13a   :  { %239 = vmatmul.f32.vlgmr.msra.gmra.mxu2 %v201_v8 }
 0x13d   :  { %v198_v10 = vpop.f32.mrf.mxu1 }
 0x13e   :  { %v199_v11 = vadd.f32 %v323_v2, %v198_v10 }
 0x140   :  { %v202_v12 = vmax.f32 %v199_v11, 0.0 }
 0x142   :  { %242 = vmatmul.f32.gmra.mxu2 %v202_v12 }
 0x1bd   :  { %v240_v17 = vpop.f32.mrf.mxu2 }
 0x1be   :  { %v241_v18 = vadd.f32 %v324_v16, %v240_v17 }
 0x1c0   :  { %v246_v19 = vmax.f32 %v241_v18, 0.0 }
 0x1c2   :  { %284 = vmatmul.f32.vlgmr.msra.gmra.mxu3 %v246_v19 }
 0x1c5   :  { %v243_v20 = vpop.f32.mrf.mxu2 }
 0x1c6   :  { %v244_v21 = vadd.f32 %v324_v16, %v243_v20 }
 0x1c8   :  { %v247_v22 = vmax.f32 %v244_v21, 0.0 }
 0x1ca   :  { %287 = vmatmul.f32.gmra.mxu3 %v247_v22 }
 0x245   :  { %v285_v24 = vpop.f32.mrf.mxu3 }
 0x246   :  { %v286_v25 = vadd.f32 %v325_v23, %v285_v24 }
 0x248   :  { %291 = vst [vmem:[#allocation11] sm:$0xff] %v286_v25 }
 0x24d   :  { %v288_v26 = vpop.f32.mrf.mxu3 }
 0x24e   :  { %v289_v27 = vadd.f32 %v325_v23, %v288_v26 }
 0x250   :  { %292 = vst [vmem:[#allocation11 + $0x8] sm:$0xff] %v289_v27 }
 0x251   :  { %305 = dma.vmem_to_hbm [thread:$0]  %s298_s19, 256, %s300_s6, [#allocation4], %s479_s17, %s479_s17, %s480_s18  }
 0x252   :  { %476 = dma.done.wait [#allocation4], 256  }
 0x253   :  { %477 = vsyncadd [#allocation4], 4294967040 }
 0x254   :  { %310 = vsyncpa [#allocation3], 1 }
 0x255   :  { %311 = vsyncpa [#allocation6], 1 }
 0x256   :  { %312 = vsyncpa [#allocation9], 1 }
 0x257   :  { %313 = vsyncpa [#allocation4], 1 }

</bundles_post_ra>
